<compile_context>
chip_gen: v5e
topology: v5e:2x2
jax: 0.10.0
libtpu: 0.0.40
codegen_flags: <defaults>
</compile_context>

<pallas_src>
from typing import NamedTuple

import jax
import jax.numpy as jnp
from jax.experimental import pallas as pl
from jax.experimental.pallas import tpu as pltpu

_LANE = 128


def _round_up(n, m):
    return ((n + m - 1) // m) * m


def _pad2(a, rows, cols):
    pr, pc = rows - a.shape[0], cols - a.shape[1]
    if pr or pc:
        a = jnp.pad(a, ((0, pr), (0, pc)))
    return a


def _choose_block_b(B):
    """Batch tile: multiple of 128, minimal batch padding, >= 2 grid steps once
    B >= 256 (so both v7x TensorCores are used), capped so tiles stay small."""
    cap = 1024 if B >= 4096 else 512
    best_blk, best_key = None, None
    for blk in range(_LANE, cap + 1, _LANE):
        steps = -(-B // blk)
        if B >= 2 * _LANE and steps < 2:
            continue  # would leave one v7x TensorCore idle
        pad = steps * blk - B
        key = (pad, -blk)  # minimize padding, then prefer fewer/larger steps
        if best_key is None or key < best_key:
            best_blk, best_key = blk, key
    return best_blk


def _vmem_limit_bytes(block_b, idp, d1p, d2p, cbytes):
    """Rough VMEM need for one grid step, with headroom, capped for v7x (64 MiB)."""
    x_tile = block_b * idp * 4 * 2                        # f32 x, double-buffered
    weights = (idp * d1p + d1p * d2p) * cbytes            # single-buffered (Buffered(1))
    vectors = (d1p + 2 * d2p) * 4                         # b1, b2, w3 rows (f32)
    out = block_b * 4 * 2                                 # (1, block_b) f32, double-buffered
    temps = block_b * (idp * cbytes + d1p * (4 + cbytes) + d2p * 4)  # x cast, h1(+cast), h2
    need = x_tile + weights + vectors + out + temps
    return int(min(max(int(need * 1.5) + (2 << 20), 16 << 20), 64 << 20))


class WdisParams(NamedTuple):
    w1: jax.Array   # (idp, d1p)  compute_dtype
    b1: jax.Array   # (1,  d1p)   f32
    w2: jax.Array   # (d1p, d2p)  compute_dtype
    b2: jax.Array   # (1,  d2p)   f32
    w3: jax.Array   # (1,  d2p)   f32 (layer-3 weight as a lane-dense row)
    b3: jax.Array   # (1,)        f32 scalar (SMEM)
    img_dim: int    # original (unpadded) input feature dim


def prepare_params(w1, b1, w2, b2, w3, b3, *, compute_dtype=jnp.bfloat16):
    """Pad feature dims to multiples of 128 and cast matmul weights ONCE.

    Call at parameter init/update time and reuse across forward calls, so no
    per-call weight pad/cast HBM pass is paid. Zero padding is mathematically
    inert (padded pre-activations are 0 -> ReLU 0 -> multiplied by zero rows).
    """
    img_dim, dim1 = w1.shape
    dim2 = w2.shape[1]
    idp, d1p, d2p = (_round_up(d, _LANE) for d in (img_dim, dim1, dim2))
    return WdisParams(
        w1=_pad2(jnp.asarray(w1), idp, d1p).astype(compute_dtype),
        b1=_pad2(jnp.asarray(b1).reshape(1, -1), 1, d1p).astype(jnp.float32),
        w2=_pad2(jnp.asarray(w2), d1p, d2p).astype(compute_dtype),
        b2=_pad2(jnp.asarray(b2).reshape(1, -1), 1, d2p).astype(jnp.float32),
        w3=_pad2(jnp.asarray(w3).reshape(1, -1), 1, d2p).astype(jnp.float32),
        b3=jnp.asarray(b3, jnp.float32).reshape(1),
        img_dim=int(img_dim),
    )


def wdis_kernel(x_ref, w1_ref, b1_ref, w2_ref, b2_ref, w3_ref, b3_ref, o_ref):
    # In-kernel cast to the matmul dtype (no wrapper-side cast pass over x).
    x = x_ref[...].astype(w1_ref.dtype)
    # Layer 1: MXU matmul (f32 accumulation) + bias + ReLU (VPU, f32).
    h1 = jnp.dot(x, w1_ref[...], preferred_element_type=jnp.float32)
    h1 = jnp.maximum(h1 + b1_ref[...], 0.0)
    # Layer 2: MXU matmul + bias + ReLU.
    h2 = jnp.dot(h1.astype(w2_ref.dtype), w2_ref[...],
                 preferred_element_type=jnp.float32)
    h2 = jnp.maximum(h2 + b2_ref[...], 0.0)
    # Layer 3: single output unit -> VPU multiply + lane reduce (skips an MXU
    # pass that would fill only 1 of 128/256 output columns).
    logits = jnp.sum(h2 * w3_ref[...], axis=-1) + b3_ref[0]      # (block_b,)
    # Lane-dense row store, kept as the very last op (after all MXU pushes).
    o_ref[0, :] = jax.nn.sigmoid(logits).astype(o_ref.dtype)


def wdis_forward(x, params: WdisParams, *, block_b=None):
    """Wdis MLP forward as a single fused Pallas kernel.

    x      : (B, img_dim) float32
    params : WdisParams from prepare_params (padded / pre-cast weights)
    returns  (B, 1) float32
    """
    B, img_dim = x.shape
    assert img_dim == params.img_dim, "x feature dim does not match params"
    idp, d1p = params.w1.shape
    d2p = params.w2.shape[1]
    cbytes = jnp.dtype(params.w1.dtype).itemsize

    if block_b is None:
        block_b = _choose_block_b(B)
    assert block_b % _LANE == 0, "block_b must be a multiple of 128"
    b_pad = _round_up(B, block_b)
    grid_n = b_pad // block_b

    # x stays float32 (cast happens inside the kernel); pad only if needed.
    xp = x.astype(jnp.float32)
    if b_pad != B or idp != img_dim:
        xp = _pad2(xp, b_pad, idp)

    # Constant-index inputs: single buffer (double-buffering buys nothing and
    # doubles weight VMEM residency — matters on v7x's 64 MiB VMEM).
    const = dict(pipeline_mode=pl.Buffered(1))
    in_specs = [
        pl.BlockSpec((block_b, idp), lambda i: (i, 0)),               # x tile (pipelined)
        pl.BlockSpec((idp, d1p), lambda i: (0, 0), **const),          # w1
        pl.BlockSpec((1, d1p),   lambda i: (0, 0), **const),          # b1
        pl.BlockSpec((d1p, d2p), lambda i: (0, 0), **const),          # w2
        pl.BlockSpec((1, d2p),   lambda i: (0, 0), **const),          # b2
        pl.BlockSpec((1, d2p),   lambda i: (0, 0), **const),          # w3 row
        pl.BlockSpec(memory_space=pltpu.MemorySpace.SMEM),            # b3 scalar
    ]
    # Lane-dense output: one (1, block_b) row per grid step.
    out_spec = pl.BlockSpec((1, block_b), lambda i: (0, i))

    # TODO(synk): for very wide layers (padded bf16 weights approaching ~32 MiB)
    # add a dim1 reduction grid axis (K/N tiling + f32 VMEM accumulator,
    # "arbitrary" semantics) instead of the single-block weight layout.
    out_row = pl.pallas_call(
        wdis_kernel,
        out_shape=jax.ShapeDtypeStruct((1, b_pad), jnp.float32),
        grid_spec=pltpu.PrefetchScalarGridSpec(
            num_scalar_prefetch=0,
            grid=(grid_n,),
            in_specs=in_specs,
            out_specs=out_spec,
        ),
        compiler_params=pltpu.CompilerParams(
            dimension_semantics=("parallel",),
            vmem_limit_bytes=_vmem_limit_bytes(block_b, idp, d1p, d2p, cbytes),
        ),
    )(xp, params.w1, params.b1, params.w2, params.b2, params.w3, params.b3)

    return out_row[0, :B].reshape(B, 1)


def init_params(key, img_dim, dim1, dim2):
    """Deterministic synthetic init (uniform, PyTorch-Linear-style bounds)."""
    ks = jax.random.split(key, 6)

    def lin(kw, kb, fan_in, fan_out):
        bound = 1.0 / jnp.sqrt(fan_in)
        w = jax.random.uniform(kw, (fan_in, fan_out), jnp.float32, -bound, bound)
        b = jax.random.uniform(kb, (1, fan_out), jnp.float32, -bound, bound)
        return w, b

    w1, b1 = lin(ks[0], ks[1], img_dim, dim1)
    w2, b2 = lin(ks[2], ks[3], dim1, dim2)
    w3, b3 = lin(ks[4], ks[5], dim2, 1)
    return w1, b1, w2, b2, w3, b3


def _ref_forward(x, w1, b1, w2, b2, w3, b3):
    h1 = jnp.maximum(x @ w1 + b1, 0.0)
    h2 = jnp.maximum(h1 @ w2 + b2, 0.0)
    return jax.nn.sigmoid(h2 @ w3 + b3)


if __name__ == "__main__":
    # Small shapes consistent with the module: batch=8, img_dim=32, dim1=64, dim2=32.
    B, IMG_DIM, DIM1, DIM2 = 8, 32, 64, 32

    key = jax.random.PRNGKey(0)
    k_x, k_p, k_x2, k_p2 = jax.random.split(key, 4)
    x = jax.random.normal(k_x, (B, IMG_DIM), dtype=jnp.float32)
    w1, b1, w2, b2, w3, b3 = init_params(k_p, IMG_DIM, DIM1, DIM2)
    ref = _ref_forward(x, w1, b1, w2, b2, w3, b3)

    # Exact path (f32 matmuls); params prepared once, reused across calls.
    p_f32 = prepare_params(w1, b1, w2, b2, w3, b3, compute_dtype=jnp.float32)
    out_f32 = jax.block_until_ready(wdis_forward(x, p_f32))
    assert out_f32.shape == (B, 1)
    assert jnp.allclose(out_f32, ref, atol=1e-4), "f32 kernel mismatch vs. reference"

    # Default fast path (bf16 matmul operands, f32 accumulation).
    p_bf16 = prepare_params(w1, b1, w2, b2, w3, b3)
    out_bf16 = jax.block_until_ready(wdis_forward(x, p_bf16))
    assert out_bf16.shape == (B, 1)
    assert jnp.max(jnp.abs(out_bf16 - ref)) < 1e-2, "bf16 kernel mismatch vs. reference"

    # 128-aligned shapes: exercises the no-pad x path, >= 2 grid steps
    # (megacore sharding), and single-buffered weights.
    B2, ID2, D12, D22 = 256, 128, 256, 128
    x2 = jax.random.normal(k_x2, (B2, ID2), dtype=jnp.float32)
    w1b, b1b, w2b, b2b, w3b, b3b = init_params(k_p2, ID2, D12, D22)
    ref2 = _ref_forward(x2, w1b, b1b, w2b, b2b, w3b, b3b)
    p2 = prepare_params(w1b, b1b, w2b, b2b, w3b, b3b, compute_dtype=jnp.float32)
    out2 = jax.block_until_ready(wdis_forward(x2, p2))
    assert out2.shape == (B2, 1)
    assert jnp.allclose(out2, ref2, atol=1e-3), "aligned-shape kernel mismatch vs. reference"

    print("KERNEL_OK")
</pallas_src>

<mosaic_0001>
module attributes {stable_mosaic.version = 11 : i64} {
  func.func @wdis_kernel(%arg0: i32, %arg1: memref<128x128xf32, #tpu.memory_space<vmem>>, %arg2: memref<128x128xf32, #tpu.memory_space<vmem>>, %arg3: memref<1x128xf32, #tpu.memory_space<vmem>>, %arg4: memref<128x128xf32, #tpu.memory_space<vmem>>, %arg5: memref<1x128xf32, #tpu.memory_space<vmem>>, %arg6: memref<1x128xf32, #tpu.memory_space<vmem>>, %arg7: memref<1xf32, #tpu.memory_space<smem>>, %arg8: memref<1x128xf32, #tpu.memory_space<vmem>>) attributes {dimension_semantics = [#tpu.dimension_semantics<parallel>], iteration_bounds = array<i64: 1>, scalar_prefetch = 0 : i64, scratch_operands = 0 : i64, tpu.core_type = #tpu.core_type<tc>, window_params = [{transform_indices = @transform_0, window_bounds = array<i64: 128, 128>}, {pipeline_mode = #tpu.pipeline_mode<synchronous>, transform_indices = @transform_1, window_bounds = array<i64: 128, 128>}, {pipeline_mode = #tpu.pipeline_mode<synchronous>, transform_indices = @transform_2, window_bounds = array<i64: 1, 128>}, {pipeline_mode = #tpu.pipeline_mode<synchronous>, transform_indices = @transform_3, window_bounds = array<i64: 128, 128>}, {pipeline_mode = #tpu.pipeline_mode<synchronous>, transform_indices = @transform_4, window_bounds = array<i64: 1, 128>}, {pipeline_mode = #tpu.pipeline_mode<synchronous>, transform_indices = @transform_5, window_bounds = array<i64: 1, 128>}, {transform_indices = @transform_6, window_bounds = array<i64: 1>}, {transform_indices = @transform_7, window_bounds = array<i64: 1, 128>}]} {
    %c0 = arith.constant 0 : index
    %c0_0 = arith.constant 0 : index
    %0 = vector.load %arg1[%c0, %c0_0] : memref<128x128xf32, #tpu.memory_space<vmem>>, vector<128x128xf32>
    %c0_1 = arith.constant 0 : index
    %c0_2 = arith.constant 0 : index
    %1 = vector.load %arg2[%c0_1, %c0_2] : memref<128x128xf32, #tpu.memory_space<vmem>>, vector<128x128xf32>
    %cst = arith.constant dense<0.000000e+00> : vector<128x128xf32>
    %2 = tpu.matmul %0, %1, %cst {dimension_numbers = #tpu.dot_dimension_numbers<[1], [0], [0], [1], [0, 0, 1, 1], [], []>} : vector<128x128xf32>, vector<128x128xf32>, vector<128x128xf32> -> vector<128x128xf32>
    %c0_3 = arith.constant 0 : index
    %c0_4 = arith.constant 0 : index
    %3 = vector.load %arg3[%c0_3, %c0_4] : memref<1x128xf32, #tpu.memory_space<vmem>>, vector<1x128xf32>
    %4 = vector.broadcast %3 : vector<1x128xf32> to vector<128x128xf32>
    %5 = arith.addf %2, %4 : vector<128x128xf32>
    %cst_5 = arith.constant 0.000000e+00 : f32
    %6 = vector.broadcast %cst_5 : f32 to vector<128x128xf32>
    %7 = arith.maximumf %5, %6 : vector<128x128xf32>
    %c0_6 = arith.constant 0 : index
    %c0_7 = arith.constant 0 : index
    %8 = vector.load %arg4[%c0_6, %c0_7] : memref<128x128xf32, #tpu.memory_space<vmem>>, vector<128x128xf32>
    %cst_8 = arith.constant dense<0.000000e+00> : vector<128x128xf32>
    %9 = tpu.matmul %7, %8, %cst_8 {dimension_numbers = #tpu.dot_dimension_numbers<[1], [0], [0], [1], [0, 0, 1, 1], [], []>} : vector<128x128xf32>, vector<128x128xf32>, vector<128x128xf32> -> vector<128x128xf32>
    %c0_9 = arith.constant 0 : index
    %c0_10 = arith.constant 0 : index
    %10 = vector.load %arg5[%c0_9, %c0_10] : memref<1x128xf32, #tpu.memory_space<vmem>>, vector<1x128xf32>
    %11 = vector.broadcast %10 : vector<1x128xf32> to vector<128x128xf32>
    %12 = arith.addf %9, %11 : vector<128x128xf32>
    %cst_11 = arith.constant 0.000000e+00 : f32
    %13 = vector.broadcast %cst_11 : f32 to vector<128x128xf32>
    %14 = arith.maximumf %12, %13 : vector<128x128xf32>
    %c0_12 = arith.constant 0 : index
    %c0_13 = arith.constant 0 : index
    %15 = vector.load %arg6[%c0_12, %c0_13] : memref<1x128xf32, #tpu.memory_space<vmem>>, vector<1x128xf32>
    %16 = vector.broadcast %15 : vector<1x128xf32> to vector<128x128xf32>
    %17 = arith.mulf %14, %16 : vector<128x128xf32>
    %cst_14 = arith.constant dense<0.000000e+00> : vector<128xf32>
    %18 = vector.multi_reduction <add>, %17, %cst_14 [1] : vector<128x128xf32> to vector<128xf32>
    %c0_15 = arith.constant 0 : index
    %19 = memref.load %arg7[%c0_15] : memref<1xf32, #tpu.memory_space<smem>>
    %20 = vector.broadcast %19 : f32 to vector<128xf32>
    %21 = arith.addf %18, %20 : vector<128xf32>
    %22 = arith.negf %21 : vector<128xf32>
    %23 = math.exp %22 : vector<128xf32>
    %cst_16 = arith.constant 1.000000e+00 : f32
    %24 = vector.broadcast %cst_16 : f32 to vector<128xf32>
    %25 = arith.addf %24, %23 : vector<128xf32>
    %26 = arith.divf %24, %25 : vector<128xf32>
    %c0_17 = arith.constant 0 : index
    %c0_18 = arith.constant 0 : index
    %27 = vector.load %arg8[%c0_17, %c0_18] : memref<1x128xf32, #tpu.memory_space<vmem>>, vector<1x128xf32>
    %28 = vector.shape_cast %27 : vector<1x128xf32> to vector<128xf32>
    %29 = vector.shape_cast %26 : vector<128xf32> to vector<1x128xf32>
    tpu.vector_store %arg8[%c0_17, %c0_18], %29 {strides = array<i32>} : memref<1x128xf32, #tpu.memory_space<vmem>>, vector<1x128xf32>,
    return
  }
  func.func @transform_0(%arg0: i32) -> (i32, i32) {
    %c0_i32 = arith.constant 0 : i32
    %c0_i32_0 = arith.constant 0 : i32
    return %arg0, %c0_i32 : i32, i32
  }
  func.func @transform_1(%arg0: i32) -> (i32, i32) {
    %c0_i32 = arith.constant 0 : i32
    %c0_i32_0 = arith.constant 0 : i32
    %c0_i32_1 = arith.constant 0 : i32
    return %c0_i32, %c0_i32_0 : i32, i32
  }
  func.func @transform_2(%arg0: i32) -> (i32, i32) {
    %c0_i32 = arith.constant 0 : i32
    %c0_i32_0 = arith.constant 0 : i32
    %c0_i32_1 = arith.constant 0 : i32
    return %c0_i32, %c0_i32_0 : i32, i32
  }
  func.func @transform_3(%arg0: i32) -> (i32, i32) {
    %c0_i32 = arith.constant 0 : i32
    %c0_i32_0 = arith.constant 0 : i32
    %c0_i32_1 = arith.constant 0 : i32
    return %c0_i32, %c0_i32_0 : i32, i32
  }
  func.func @transform_4(%arg0: i32) -> (i32, i32) {
    %c0_i32 = arith.constant 0 : i32
    %c0_i32_0 = arith.constant 0 : i32
    %c0_i32_1 = arith.constant 0 : i32
    return %c0_i32, %c0_i32_0 : i32, i32
  }
  func.func @transform_5(%arg0: i32) -> (i32, i32) {
    %c0_i32 = arith.constant 0 : i32
    %c0_i32_0 = arith.constant 0 : i32
    %c0_i32_1 = arith.constant 0 : i32
    return %c0_i32, %c0_i32_0 : i32, i32
  }
  func.func @transform_6(%arg0: i32) -> i32 {
    %c0_i32 = arith.constant 0 : i32
    %c0_i32_0 = arith.constant 0 : i32
    return %c0_i32 : i32
  }
  func.func @transform_7(%arg0: i32) -> (i32, i32) {
    %c0_i32 = arith.constant 0 : i32
    %c0_i32_0 = arith.constant 0 : i32
    return %c0_i32, %arg0 : i32, i32
  }
}

</mosaic_0001>

<bundles_post_ra>
// kernel: tpu_custom_call.1
= control target key start
LH: loop header
LB: loop body
LE: loop exit
PB: predicated region body
PF: predicated region fallthrough
CT: control target
= control target key end

     0   :  { %13 = vsyncpa [#allocation4], 0  ;;  %s1576_s0 = inlined_call_operand.hbm [shape: f32[128,128], index: 0, kind: input, shape index: {}]   ;;  %s1577_s1 = inlined_call_operand.hbm [shape: f32[128,128], index: 1, kind: input, shape index: {}]   ;;  %s1578_s2 = inlined_call_operand.vmem [shape: f32[1,128], index: 2, kind: input, shape index: {}]   ;;  %s1579_s3 = inlined_call_operand.hbm [shape: f32[128,128], index: 3, kind: input, shape index: {}]   ;;  %s1580_s4 = inlined_call_operand.vmem [shape: f32[1,128], index: 4, kind: input, shape index: {}]   ;;  %s1581_s5 = inlined_call_operand.vmem [shape: f32[1,128], index: 5, kind: input, shape index: {}]   ;;  %s1582_s6 = inlined_call_operand.<no memory space> [shape: f32[1], index: 6, kind: input, shape index: {}]   ;;  %s1583_s7 = inlined_call_operand.hbm [shape: f32[1,128], index: 7, kind: output, shape index: {}]  }
   0x1   :  { %14 = vsyncpa [#allocation7], 0 }
   0x2   :  { %15 = vsyncpa [#allocation5], 0  ;;  %s33_s26 = sshll.u32 %s1577_s1, 4  ;;  %s989_s27 = smov [#allocation6]   ;;  %s34_s26 = int_to_ptr.hbm [resolvable:$true] %s33_s26 }
   0x3   :  { %s35_s28 = sshll.u32 %s989_s27, 4  ;;  %s20_s8 = sshll.u32 %s1576_s0, 4  ;;  %s36_s28 = int_to_ptr.vmem [resolvable:$true] %s35_s28  ;;  %s21_s8 = int_to_ptr.hbm [resolvable:$true] %s20_s8 }
   0x4   :  { %s990_s9 = smov 128   ;;  %s991_s10 = smov 8  }
   0x5   :  { %41 = dma.hbm_to_vmem [thread:$0]  %s34_s26, 2048, %s36_s28, [#allocation7], %s990_s9, %s990_s9, %s991_s10  }
   0x6   :  { %s992_s11 = smov [#allocation3]   ;;  %s48_s15 = sshll.u32 %s1579_s3, 4  ;;  %s49_s15 = int_to_ptr.hbm [resolvable:$true] %s48_s15 }
   0x7   :  { %s22_s12 = sshll.u32 %s992_s11, 4  ;;  %s993_s1 = smov [#allocation8]   ;;  %s23_s12 = int_to_ptr.vmem [resolvable:$true] %s22_s12 }
   0x8   :  { %28 = dma.hbm_to_vmem [thread:$0]  %s21_s8, 2048, %s23_s12, [#allocation4], %s990_s9, %s990_s9, %s991_s10  }
   0x9   :  { %s50_s16 = sshll.u32 %s993_s1, 4  ;;  %s51_s16 = int_to_ptr.vmem [resolvable:$true] %s50_s16 }
   0xa   :  { %56 = dma.hbm_to_vmem [thread:$0]  %s49_s15, 2048, %s51_s16, [#allocation7], %s990_s9, %s990_s9, %s991_s10  }
   0xb   :  { %983 = dma.done.wait [#allocation4], 2048  }
   0xc   :  { %984 = vsyncadd [#allocation4], 4294965248 }
   0xd   :  { %985 = dma.done.wait [#allocation7], 4096  }
   0xe   :  { %986 = vsyncadd [#allocation7], 4294963200  ;;  %v106_v0 = vld [vmem:[#allocation6 + $0x78] sm:$0xff]  ;;  %v105_v1 = vld [vmem:[#allocation6 + $0x70] sm:$0xff]  ;;  %vm688_vm11 = vcmask 130112   ;;  %s755_s23 = sshll.u32 %s1583_s7, 4  ;;  %s756_s23 = int_to_ptr.hbm [resolvable:$true] %s755_s23 }
   0xf   :  { %111 = vmatpush.msra.mxu0 %v106_v0  ;;  %782 = vmatpush.msra.mxu2 %v106_v0  ;;  %v104_v2 = vld [vmem:[#allocation6 + $0x68] sm:$0xff]  ;;  %v103_v3 = vld [vmem:[#allocation6 + $0x60] sm:$0xff]  ;;  %v102_v4 = vld [vmem:[#allocation6 + $0x58] sm:$0xff] }
  0x10   :  { %v101_v5 = vld [vmem:[#allocation6 + $0x50] sm:$0xff]  ;;  %v100_v6 = vld [vmem:[#allocation6 + $0x48] sm:$0xff]  ;;  %v99_v7 = vld [vmem:[#allocation6 + $0x40] sm:$0xff] }
  0x11   :  { %112 = vmatpush.msra.mxu0 %v105_v1  ;;  %783 = vmatpush.msra.mxu2 %v105_v1  ;;  %v98_v8 = vld [vmem:[#allocation6 + $0x38] sm:$0xff]  ;;  %v97_v9 = vld [vmem:[#allocation6 + $0x30] sm:$0xff]  ;;  %v96_v10 = vld [vmem:[#allocation6 + $0x28] sm:$0xff] }
  0x12   :  { %v95_v11 = vld [vmem:[#allocation6 + $0x20] sm:$0xff]  ;;  %v94_v12 = vld [vmem:[#allocation6 + $0x18] sm:$0xff]  ;;  %v93_v13 = vld [vmem:[#allocation6 + $0x10] sm:$0xff] }
  0x13   :  { %113 = vmatpush.msra.mxu0 %v104_v2  ;;  %784 = vmatpush.msra.mxu2 %v104_v2  ;;  %v92_v14 = vld [vmem:[#allocation6 + $0x8] sm:$0xff]  ;;  %v91_v15 = vld [vmem:[#allocation6] sm:$0xff]  ;;  %v77_v20 = vld [vmem:[#allocation3 + $0x10] sm:$0xff] }
  0x14   :  { %v75_v16 = vld [vmem:[#allocation3] sm:$0xff]  ;;  %v76_v18 = vld [vmem:[#allocation3 + $0x8] sm:$0xff]  ;;  %v85_v21 = vld [vmem:[#allocation3 + $0x50] sm:$0xff] }
  0x15   :  { %114 = vmatpush.msra.mxu0 %v103_v3  ;;  %785 = vmatpush.msra.mxu2 %v103_v3  ;;  %v83_v17 = vld [vmem:[#allocation3 + $0x40] sm:$0xff]  ;;  %v84_v19 = vld [vmem:[#allocation3 + $0x48] sm:$0xff]  ;;  %v78_v22 = vld [vmem:[#allocation3 + $0x18] sm:$0xff] }
  0x16   :  { %v86_v23 = vld [vmem:[#allocation3 + $0x58] sm:$0xff]  ;;  %v206_v25 = vld [vmem:[#allocation8 + $0x70] sm:$0xff]  ;;  %v205_v26 = vld [vmem:[#allocation8 + $0x68] sm:$0xff] }
  0x17   :  { %115 = vmatpush.msra.mxu0 %v102_v4  ;;  %786 = vmatpush.msra.mxu2 %v102_v4  ;;  %v207_v24 = vld [vmem:[#allocation8 + $0x78] sm:$0xff]  ;;  %v204_v27 = vld [vmem:[#allocation8 + $0x60] sm:$0xff]  ;;  %v202_v31 = vld [vmem:[#allocation8 + $0x50] sm:$0xff] }
  0x18   :  { %212 = vmatpush.msra.mxu1 %v207_v24  ;;  %798 = vmatpush.msra.mxu3 %v207_v24  ;;  %v79_v28 = vld [vmem:[#allocation3 + $0x20] sm:$0xff]  ;;  %v203_v30 = vld [vmem:[#allocation8 + $0x58] sm:$0xff]  ;;  %v201_v32 = vld [vmem:[#allocation8 + $0x48] sm:$0xff] }
  0x19   :  { %116 = vmatpush.msra.mxu0 %v101_v5  ;;  %787 = vmatpush.msra.mxu2 %v101_v5  ;;  %v87_v29 = vld [vmem:[#allocation3 + $0x60] sm:$0xff]  ;;  %v80_v34 = vld [vmem:[#allocation3 + $0x28] sm:$0xff]  ;;  %v199_v36 = vld [vmem:[#allocation8 + $0x38] sm:$0xff] }
  0x1a   :  { %213 = vmatpush.msra.mxu1 %v206_v25  ;;  %799 = vmatpush.msra.mxu3 %v206_v25  ;;  %v200_v33 = vld [vmem:[#allocation8 + $0x40] sm:$0xff]  ;;  %v88_v35 = vld [vmem:[#allocation3 + $0x68] sm:$0xff]  ;;  %v198_v37 = vld [vmem:[#allocation8 + $0x30] sm:$0xff] }
  0x1b   :  { %117 = vmatpush.msra.mxu0 %v100_v6  ;;  %788 = vmatpush.msra.mxu2 %v100_v6  ;;  %v197_v38 = vld [vmem:[#allocation8 + $0x28] sm:$0xff]  ;;  %v196_v39 = vld [vmem:[#allocation8 + $0x20] sm:$0xff]  ;;  %v81_v40 = vld [vmem:[#allocation3 + $0x30] sm:$0xff] }
  0x1c   :  { %214 = vmatpush.msra.mxu1 %v205_v26  ;;  %800 = vmatpush.msra.mxu3 %v205_v26  ;;  %v89_v41 = vld [vmem:[#allocation3 + $0x70] sm:$0xff]  ;;  %v195_v42 = vld [vmem:[#allocation8 + $0x18] sm:$0xff]  ;;  %v193_v46 = vld [vmem:[#allocation8 + $0x8] sm:$0xff] }
  0x1d   :  { %118 = vmatpush.msra.mxu0 %v99_v7  ;;  %789 = vmatpush.msra.mxu2 %v99_v7  ;;  %v82_v43 = vld [vmem:[#allocation3 + $0x38] sm:$0xff]  ;;  %v194_v45 = vld [vmem:[#allocation8 + $0x10] sm:$0xff]  ;;  %v192_v47 = vld [vmem:[#allocation8] sm:$0xff] }
  0x1e   :  { %215 = vmatpush.msra.mxu1 %v204_v27  ;;  %801 = vmatpush.msra.mxu3 %v204_v27  ;;  %v90_v44 = vld [vmem:[#allocation3 + $0x78] sm:$0xff]  ;;  %v820_v48 = vld [vmem:[%s1578_s2] ss:$0 sm:$0xff] }
  0x1f   :  { %119 = vmatpush.msra.mxu0 %v98_v8  ;;  %790 = vmatpush.msra.mxu2 %v98_v8 }
  0x20   :  { %216 = vmatpush.msra.mxu1 %v203_v30  ;;  %802 = vmatpush.msra.mxu3 %v203_v30 }
  0x21   :  { %120 = vmatpush.msra.mxu0 %v97_v9  ;;  %791 = vmatpush.msra.mxu2 %v97_v9 }
  0x22   :  { %217 = vmatpush.msra.mxu1 %v202_v31  ;;  %803 = vmatpush.msra.mxu3 %v202_v31 }
  0x23   :  { %121 = vmatpush.msra.mxu0 %v96_v10  ;;  %792 = vmatpush.msra.mxu2 %v96_v10 }
  0x24   :  { %218 = vmatpush.msra.mxu1 %v201_v32  ;;  %804 = vmatpush.msra.mxu3 %v201_v32 }
  0x25   :  { %122 = vmatpush.msra.mxu0 %v95_v11  ;;  %793 = vmatpush.msra.mxu2 %v95_v11 }
  0x26   :  { %219 = vmatpush.msra.mxu1 %v200_v33  ;;  %805 = vmatpush.msra.mxu3 %v200_v33  ;;  %v1050_v33 = vld [vmem:[%s1580_s4] ss:$0 sm:$0xff] }
  0x27   :  { %123 = vmatpush.msra.mxu0 %v94_v12  ;;  %794 = vmatpush.msra.mxu2 %v94_v12 }
  0x28   :  { %220 = vmatpush.msra.mxu1 %v199_v36  ;;  %806 = vmatpush.msra.mxu3 %v199_v36  ;;  %v1056_v36 = vld [vmem:[%s1581_s5] ss:$0 sm:$0xff] }
  0x29   :  { %124 = vmatpush.msra.mxu0 %v93_v13  ;;  %795 = vmatpush.msra.mxu2 %v93_v13 }
  0x2a   :  { %221 = vmatpush.msra.mxu1 %v198_v37  ;;  %807 = vmatpush.msra.mxu3 %v198_v37 }
  0x2b   :  { %125 = vmatpush.msra.mxu0 %v92_v14  ;;  %796 = vmatpush.msra.mxu2 %v92_v14 }
  0x2c   :  { %222 = vmatpush.msra.mxu1 %v197_v38  ;;  %808 = vmatpush.msra.mxu3 %v197_v38 }
  0x2d   :  { %126 = vmatpush.msra.mxu0 %v91_v15  ;;  %797 = vmatpush.msra.mxu2 %v91_v15 }
  0x2e   :  { %127 = vmatmul.f32.vlgmr.msra.gmra.mxu0 %v75_v16  ;;  %151 = vmatmul.f32.vlgmr.msra.gmra.mxu2 %v83_v17 }
  0x2f   :  { %223 = vmatpush.msra.mxu1 %v196_v39  ;;  %809 = vmatpush.msra.mxu3 %v196_v39 }
  0x31   :  { %224 = vmatpush.msra.mxu1 %v195_v42  ;;  %810 = vmatpush.msra.mxu3 %v195_v42 }
  0x33   :  { %225 = vmatpush.msra.mxu1 %v194_v45  ;;  %811 = vmatpush.msra.mxu3 %v194_v45 }
  0x35   :  { %226 = vmatpush.msra.mxu1 %v193_v46  ;;  %812 = vmatpush.msra.mxu3 %v193_v46 }
  0x36   :  { %130 = vmatmul.f32.gmra.mxu0 %v76_v18  ;;  %154 = vmatmul.f32.gmra.mxu2 %v84_v19 }
  0x37   :  { %227 = vmatpush.msra.mxu1 %v192_v47  ;;  %813 = vmatpush.msra.mxu3 %v192_v47 }
  0x3e   :  { %133 = vmatmul.f32.gmra.mxu0 %v77_v20  ;;  %157 = vmatmul.f32.gmra.mxu2 %v85_v21 }
  0x46   :  { %136 = vmatmul.f32.gmra.mxu0 %v78_v22  ;;  %160 = vmatmul.f32.gmra.mxu2 %v86_v23 }
  0x4e   :  { %139 = vmatmul.f32.gmra.mxu0 %v79_v28  ;;  %163 = vmatmul.f32.gmra.mxu2 %v87_v29 }
  0x56   :  { %142 = vmatmul.f32.gmra.mxu0 %v80_v34  ;;  %166 = vmatmul.f32.gmra.mxu2 %v88_v35 }
  0x5e   :  { %145 = vmatmul.f32.gmra.mxu0 %v81_v40  ;;  %169 = vmatmul.f32.gmra.mxu2 %v89_v41 }
  0x66   :  { %148 = vmatmul.f32.gmra.mxu0 %v82_v43  ;;  %172 = vmatmul.f32.gmra.mxu2 %v90_v44 }
  0xab   :  { %v128_v49 = vpop.f32.mrf.mxu0 }
  0xac   :  { %v129_v50 = vadd.f32 %v820_v48, %v128_v49 }
  0xae   :  { %v176_v51 = vmax.f32 %v129_v50, 0.0 }
  0xb0   :  { %228 = vmatmul.f32.vlgmr.msra.gmra.mxu1 %v176_v51 }
  0xb1   :  { %v152_v52 = vpop.f32.mrf.mxu2 }
  0xb2   :  { %v153_v53 = vadd.f32 %v820_v48, %v152_v52 }
  0xb3   :  { %v131_v54 = vpop.f32.mrf.mxu0 }
  0xb4   :  { %v184_v55 = vmax.f32 %v153_v53, 0.0  ;;  %v132_v56 = vadd.f32 %v820_v48, %v131_v54 }
  0xb6   :  { %v177_v57 = vmax.f32 %v132_v56, 0.0  ;;  %252 = vmatmul.f32.vlgmr.msra.gmra.mxu3 %v184_v55 }
  0xb8   :  { %231 = vmatmul.f32.gmra.mxu1 %v177_v57 }
  0xb9   :  { %v155_v58 = vpop.f32.mrf.mxu2 }
  0xba   :  { %v156_v59 = vadd.f32 %v820_v48, %v155_v58 }
  0xbb   :  { %v134_v60 = vpop.f32.mrf.mxu0 }
  0xbc   :  { %v185_v61 = vmax.f32 %v156_v59, 0.0  ;;  %v135_v62 = vadd.f32 %v820_v48, %v134_v60 }
  0xbe   :  { %v178_v63 = vmax.f32 %v135_v62, 0.0  ;;  %255 = vmatmul.f32.gmra.mxu3 %v185_v61 }
  0xc0   :  { %234 = vmatmul.f32.gmra.mxu1 %v178_v63 }
  0xc1   :  { %v158_v0 = vpop.f32.mrf.mxu2 }
  0xc2   :  { %v159_v1 = vadd.f32 %v820_v48, %v158_v0 }
  0xc3   :  { %v137_v2 = vpop.f32.mrf.mxu0 }
  0xc4   :  { %v186_v3 = vmax.f32 %v159_v1, 0.0  ;;  %v138_v4 = vadd.f32 %v820_v48, %v137_v2 }
  0xc6   :  { %v179_v5 = vmax.f32 %v138_v4, 0.0  ;;  %258 = vmatmul.f32.gmra.mxu3 %v186_v3 }
  0xc8   :  { %237 = vmatmul.f32.gmra.mxu1 %v179_v5 }
  0xc9   :  { %v161_v6 = vpop.f32.mrf.mxu2 }
  0xca   :  { %v162_v7 = vadd.f32 %v820_v48, %v161_v6 }
  0xcb   :  { %v140_v8 = vpop.f32.mrf.mxu0 }
  0xcc   :  { %v187_v9 = vmax.f32 %v162_v7, 0.0  ;;  %v141_v10 = vadd.f32 %v820_v48, %v140_v8 }
  0xce   :  { %v180_v11 = vmax.f32 %v141_v10, 0.0  ;;  %261 = vmatmul.f32.gmra.mxu3 %v187_v9 }
  0xd0   :  { %240 = vmatmul.f32.gmra.mxu1 %v180_v11 }
  0xd1   :  { %v164_v12 = vpop.f32.mrf.mxu2 }
  0xd2   :  { %v165_v13 = vadd.f32 %v820_v48, %v164_v12 }
  0xd3   :  { %v143_v14 = vpop.f32.mrf.mxu0 }
  0xd4   :  { %v188_v15 = vmax.f32 %v165_v13, 0.0  ;;  %v144_v16 = vadd.f32 %v820_v48, %v143_v14 }
  0xd6   :  { %v181_v17 = vmax.f32 %v144_v16, 0.0  ;;  %264 = vmatmul.f32.gmra.mxu3 %v188_v15 }
  0xd8   :  { %243 = vmatmul.f32.gmra.mxu1 %v181_v17 }
  0xd9   :  { %v167_v18 = vpop.f32.mrf.mxu2 }
  0xda   :  { %v168_v19 = vadd.f32 %v820_v48, %v167_v18 }
  0xdb   :  { %v146_v20 = vpop.f32.mrf.mxu0 }
  0xdc   :  { %v189_v21 = vmax.f32 %v168_v19, 0.0  ;;  %v147_v22 = vadd.f32 %v820_v48, %v146_v20 }
  0xde   :  { %v182_v23 = vmax.f32 %v147_v22, 0.0  ;;  %267 = vmatmul.f32.gmra.mxu3 %v189_v21 }
  0xe0   :  { %246 = vmatmul.f32.gmra.mxu1 %v182_v23 }
  0xe1   :  { %v170_v24 = vpop.f32.mrf.mxu2 }
  0xe2   :  { %v171_v25 = vadd.f32 %v820_v48, %v170_v24 }
  0xe3   :  { %v149_v26 = vpop.f32.mrf.mxu0 }
  0xe4   :  { %v190_v27 = vmax.f32 %v171_v25, 0.0  ;;  %v150_v28 = vadd.f32 %v820_v48, %v149_v26 }
  0xe6   :  { %v183_v29 = vmax.f32 %v150_v28, 0.0  ;;  %270 = vmatmul.f32.gmra.mxu3 %v190_v27 }
  0xe8   :  { %249 = vmatmul.f32.gmra.mxu1 %v183_v29 }
  0xe9   :  { %v173_v30 = vpop.f32.mrf.mxu2 }
  0xea   :  { %v174_v31 = vadd.f32 %v820_v48, %v173_v30 }
  0xec   :  { %v191_v32 = vmax.f32 %v174_v31, 0.0 }
  0xee   :  { %273 = vmatmul.f32.gmra.mxu3 %v191_v32 }
 0x12d   :  { %v229_v34 = vpop.f32.mrf.mxu1 }
 0x12e   :  { %v230_v35 = vadd.f32 %v1050_v33, %v229_v34 }
 0x130   :  { %v277_v37 = vmax.f32 %v230_v35, 0.0 }
 0x132   :  { %v297_v38 = vmul.f32 %v1056_v36, %v277_v37  ;;  %v1092_v37 = vstv %s1582_s6  ;;  %s994_s6 = smov [#allocation9]  }
 0x133   :  { %s753_s20 = sshll.u32 %s994_s6, 4  ;;  %s754_s20 = int_to_ptr.vmem [resolvable:$true] %s753_s20 }
 0x134   :  { %313 = vadd.xlane.f32.xlu0 %v297_v38 }
 0x135   :  { %v232_v39 = vpop.f32.mrf.mxu1 }
 0x136   :  { %v233_v40 = vadd.f32 %v1050_v33, %v232_v39 }
 0x138   :  { %v278_v41 = vmax.f32 %v233_v40, 0.0 }
 0x139   :  { %v253_v42 = vpop.f32.mrf.mxu3 }
 0x13a   :  { %v254_v43 = vadd.f32 %v1050_v33, %v253_v42  ;;  %v298_v44 = vmul.f32 %v1056_v36, %v278_v41 }
 0x13c   :  { %v285_v45 = vmax.f32 %v254_v43, 0.0  ;;  %315 = vadd.xlane.f32.xlu0 %v298_v44 }
 0x13d   :  { %v235_v46 = vpop.f32.mrf.mxu1 }
 0x13e   :  { %v236_v47 = vadd.f32 %v1050_v33, %v235_v46  ;;  %v305_v48 = vmul.f32 %v1056_v36, %v285_v45 }
 0x140   :  { %v279_v49 = vmax.f32 %v236_v47, 0.0  ;;  %329 = vadd.xlane.f32.xlu2 %v305_v48 }
 0x141   :  { %v256_v50 = vpop.f32.mrf.mxu3 }
 0x142   :  { %v257_v51 = vadd.f32 %v1050_v33, %v256_v50  ;;  %v299_v52 = vmul.f32 %v1056_v36, %v279_v49 }
 0x144   :  { %v286_v53 = vmax.f32 %v257_v51, 0.0  ;;  %317 = vadd.xlane.f32.xlu1 %v299_v52 }
 0x145   :  { %v238_v54 = vpop.f32.mrf.mxu1 }
 0x146   :  { %v239_v55 = vadd.f32 %v1050_v33, %v238_v54  ;;  %v306_v56 = vmul.f32 %v1056_v36, %v286_v53 }
 0x148   :  { %v280_v57 = vmax.f32 %v239_v55, 0.0  ;;  %331 = vadd.xlane.f32.xlu0 %v306_v56 }
 0x149   :  { %v259_v58 = vpop.f32.mrf.mxu3 }
 0x14a   :  { %v260_v59 = vadd.f32 %v1050_v33, %v259_v58  ;;  %v300_v60 = vmul.f32 %v1056_v36, %v280_v57 }
 0x14c   :  { %319 = vadd.xlane.f32.xlu1 %v300_v60  ;;  %v287_v62 = vmax.f32 %v260_v59, 0.0 }
 0x14d   :  { %v241_v61 = vpop.f32.mrf.mxu1 }
 0x14e   :  { %v242_v63 = vadd.f32 %v1050_v33, %v241_v61  ;;  %v307_v3 = vmul.f32 %v1056_v36, %v287_v62 }
 0x150   :  { %v281_v0 = vmax.f32 %v242_v63, 0.0 }
 0x151   :  { %v262_v1 = vpop.f32.mrf.mxu3 }
 0x152   :  { %v301_v2 = vmul.f32 %v1056_v36, %v281_v0  ;;  %v263_v8 = vadd.f32 %v1050_v33, %v262_v1 }
 0x154   :  { %321 = vadd.xlane.f32.xlu2 %v301_v2  ;;  %333 = vadd.xlane.f32.xlu1 %v307_v3  ;;  %v288_v11 = vmax.f32 %v263_v8, 0.0 }
 0x155   :  { %v244_v4 = vpop.f32.mrf.mxu1 }
 0x156   :  { %v245_v5 = vadd.f32 %v1050_v33, %v244_v4  ;;  %v308_v16 = vmul.f32 %v1056_v36, %v288_v11 }
 0x158   :  { %v282_v6 = vmax.f32 %v245_v5, 0.0 }
 0x159   :  { %v265_v7 = vpop.f32.mrf.mxu3 }
 0x15a   :  { %v302_v9 = vmul.f32 %v1056_v36, %v282_v6  ;;  %v266_v15 = vadd.f32 %v1050_v33, %v265_v7  ;;  %v683_v6 = vlaneseq }
 0x15c   :  { %323 = vadd.xlane.f32.xlu2 %v302_v9  ;;  %v289_v19 = vmax.f32 %v266_v15, 0.0 }
 0x15d   :  { %v247_v10 = vpop.f32.mrf.mxu1 }
 0x15e   :  { %v248_v12 = vadd.f32 %v1050_v33, %v247_v10  ;;  %v309_v26 = vmul.f32 %v1056_v36, %v289_v19 }
 0x160   :  { %v283_v13 = vmax.f32 %v248_v12, 0.0 }
 0x161   :  { %v268_v14 = vpop.f32.mrf.mxu3 }
 0x162   :  { %v303_v17 = vmul.f32 %v1056_v36, %v283_v13  ;;  %v269_v23 = vadd.f32 %v1050_v33, %v268_v14  ;;  %v1130_v14 = vand.u32 127, %v683_v6 }
 0x164   :  { %335 = vadd.xlane.f32.xlu2 %v308_v16  ;;  %325 = vadd.xlane.f32.xlu0 %v303_v17  ;;  %v290_v28 = vmax.f32 %v269_v23, 0.0 }
 0x165   :  { %v250_v18 = vpop.f32.mrf.mxu1 }
 0x166   :  { %v251_v20 = vadd.f32 %v1050_v33, %v250_v18  ;;  %v310_v32 = vmul.f32 %v1056_v36, %v290_v28 }
 0x168   :  { %v284_v21 = vmax.f32 %v251_v20, 0.0 }
 0x169   :  { %v271_v22 = vpop.f32.mrf.mxu3 }
 0x16a   :  { %v272_v24 = vadd.f32 %v1050_v33, %v271_v22  ;;  %v304_v25 = vmul.f32 %v1056_v36, %v284_v21 }
 0x16c   :  { %v291_v27 = vmax.f32 %v272_v24, 0.0  ;;  %327 = vadd.xlane.f32.xlu1 %v304_v25  ;;  %337 = vadd.xlane.f32.xlu0 %v309_v26  ;;  %v1142_v24 = vadd.s32 4294967288, %v1130_v14  ;;  %v1145_v25 = vadd.s32 4294967232, %v1130_v14  ;;  %v1148_v26 = vadd.s32 4294967280, %v1130_v14 }
 0x16e   :  { %v311_v29 = vmul.f32 %v1056_v36, %v291_v27 }
 0x170   :  { %341 = vadd.xlane.f32.xlu2 %v311_v29 }
 0x171   :  { %v274_v30 = vpop.f32.mrf.mxu3 }
 0x172   :  { %v275_v31 = vadd.f32 %v1050_v33, %v274_v30 }
 0x174   :  { %v292_v34 = vmax.f32 %v275_v31, 0.0  ;;  %339 = vadd.xlane.f32.xlu1 %v310_v32 }
 0x176   :  { %v312_v35 = vmul.f32 %v1056_v36, %v292_v34 }
 0x178   :  { %343 = vadd.xlane.f32.xlu0 %v312_v35 }
 0x1a7   :  { %v314_v38 = vpop.xlane.xlu0 %313 }
 0x1a8   :  { %v347_v39 = vadd.f32 %v1092_v37, %v314_v38 }
 0x1aa   :  { %v766_v40 = vmul.f32 -1.442695, %v347_v39 }
 0x1ac   :  { %823 = vpow2.f32 %v766_v40 }
 0x1af   :  { %v316_v41 = vpop.xlane.xlu0 %315 }
 0x1b0   :  { %v348_v33 = vadd.f32 %v1092_v37, %v316_v41 }
 0x1b2   :  { %v767_v42 = vmul.f32 -1.442695, %v348_v33  ;;  %v824_v43 = vpop.eup %823 }
 0x1b3   :  { %v330_v44 = vpop.xlane.xlu2 %329  ;;  %v1097_v45 = vadd.f32 1.0, %v824_v43  ;;  %v1180_v43 = vadd.s32 4294967272, %v1130_v14 }
 0x1b4   :  { %825 = vpow2.f32 %v767_v42  ;;  %v355_v36 = vadd.f32 %v1092_v37, %v330_v44  ;;  %v1177_v42 = vadd.s32 4294967224, %v1130_v14 }
 0x1b5   :  { %827 = vrcp.f32 %v1097_v45  ;;  %v436_v15 = vand.u32 2147483647, %v1097_v45  ;;  %v438_v16 = vand.u32 2147483648, %v1097_v45  ;;  %vm432_vm1 = vweird.f32 %v1097_v45 }
 0x1b6   :  { %v774_v46 = vmul.f32 -1.442695, %v355_v36 }
 0x1b7   :  { %v318_v47 = vpop.xlane.xlu1 %317  ;;  %vm1161_vm3 = vcmp.eq.f32.partialorder %v436_v15, 8.507059e+37  ;;  %v439_v38 = vor.u32 1.1754944e-38, %v438_v16 }
 0x1b8   :  { %v349_v48 = vadd.f32 %v1092_v37, %v318_v47  ;;  %829 = vpow2.f32 %v774_v46 }
 0x1ba   :  { %v826_v49 = vpop.eup %825  ;;  %v768_v50 = vmul.f32 -1.442695, %v349_v48 }
 0x1bb   :  { %v332_v51 = vpop.xlane.xlu0 %331  ;;  %v1102_v53 = vadd.f32 1.0, %v826_v49  ;;  %v1104_v56 = vpop.eup %827 }
 0x1bc   :  { %831 = vpow2.f32 %v768_v50  ;;  %v356_v52 = vadd.f32 %v1092_v37, %v332_v51  ;;  %v428_v61 = vmul.f32 %v1104_v56, %v1097_v45  ;;  %vm433_vm0 = vweird.f32 %v1104_v56 }
 0x1bd   :  { %v451_v27 = vand.u32 2147483647, %v1102_v53  ;;  %v453_v28 = vand.u32 2147483648, %v1102_v53  ;;  %vm1157_vm2 = vmor %vm432_vm1, %vm433_vm0  ;;  %vm447_vm4 = vweird.f32 %v1102_v53  ;;  %vm692_vm0 = vcmask 195712  }
 0x1be   :  { %v775_v54 = vmul.f32 -1.442695, %v356_v52  ;;  %v830_v58 = vpop.eup %829  ;;  %v429_v2 = vsub.f32 1.0, %v428_v61 }
 0x1bf   :  { %v320_v55 = vpop.xlane.xlu1 %319  ;;  %v1112_v63 = vadd.f32 1.0, %v830_v58  ;;  %vm1183_vm6 = vcmp.eq.f32.partialorder %v451_v27, 8.507059e+37  ;;  %v454_v36 = vor.u32 1.1754944e-38, %v453_v28 }
 0x1c0   :  { %833 = vpow2.f32 %v775_v54  ;;  %v350_v57 = vadd.f32 %v1092_v37, %v320_v55  ;;  %v430_v9 = vmul.f32 %v1104_v56, %v429_v2  ;;  %v1199_v55 = vadd.s32 4294967264, %v1130_v14 }
 0x1c1   :  { %835 = vrcp.f32 %v1102_v53  ;;  %v558_v33 = vand.u32 2147483648, %v1112_v63  ;;  %vm552_vm7 = vweird.f32 %v1112_v63 }
 0x1c2   :  { %v832_v59 = vpop.eup %831  ;;  %v769_v60 = vmul.f32 -1.442695, %v350_v57  ;;  %v431_v19 = vadd.f32 %v1104_v56, %v430_v9 }
 0x1c3   :  { %v1110_v62 = vadd.f32 1.0, %v832_v59  ;;  %v556_v59 = vand.u32 2147483647, %v1112_v63 }
 0x1c4   :  { %837 = vpow2.f32 %v769_v60  ;;  %v435_v35 = vsel %vm1157_vm2, %v1104_v56, %v431_v19  ;;  %v1203_v60 = vor.u32 1.1754944e-38, %v558_v33 }
 0x1c5   :  { %839 = vrcp.f32 %v1110_v62  ;;  %v1191_v47 = vsel %vm1161_vm3, %v439_v38, %v435_v35  ;;  %v466_v50 = vand.u32 2147483647, %v1110_v62  ;;  %vm462_vm8 = vweird.f32 %v1110_v62 }
 0x1c6   :  { %v834_v0 = vpop.eup %833  ;;  %841 = vrcp.f32 %v1112_v63  ;;  %vm1236_vm14 = vcmp.eq.f32.partialorder %v556_v59, 8.507059e+37 }
 0x1c7   :  { %v1115_v1 = vpop.eup %835  ;;  %v322_v3 = vpop.xlane.xlu2 %321  ;;  %v1117_v4 = vadd.f32 1.0, %v834_v0  ;;  %v685_v0 = vperm.slane %v1191_v47, %v1130_v14  ;;  %vm1224_vm10 = vcmp.eq.f32.partialorder %v466_v50, 8.507059e+37 }
 0x1c8   :  { %v334_v5 = vpop.xlane.xlu1 %333  ;;  %v443_v8 = vmul.f32 %v1115_v1, %v1102_v53  ;;  %v351_v11 = vadd.f32 %v1092_v37, %v322_v3  ;;  %vm448_vm5 = vweird.f32 %v1115_v1  ;;  %v468_v3 = vand.u32 2147483648, %v1110_v62 }
 0x1c9   :  { %v357_v12 = vadd.f32 %v1092_v37, %v334_v5  ;;  %843 = vrcp.f32 %v1117_v4  ;;  %vm1214_vm9 = vmor %vm447_vm4, %vm448_vm5  ;;  %v573_v15 = vand.u32 2147483648, %v1117_v4  ;;  %vm567_vm15 = vweird.f32 %v1117_v4 }
 0x1ca   :  { %v838_v7 = vpop.eup %837  ;;  %v444_v17 = vsub.f32 1.0, %v443_v8  ;;  %v770_v21 = vmul.f32 -1.442695, %v351_v11 }
 0x1cb   :  { %v1123_v10 = vadd.f32 1.0, %v838_v7  ;;  %v1127_v13 = vpop.eup %839  ;;  %v776_v22 = vmul.f32 -1.442695, %v357_v12  ;;  %v574_v38 = vor.u32 1.1754944e-38, %v573_v15  ;;  %v1347_v15 = vadd.s32 4294967256, %v1130_v14 }
 0x1cc   :  { %v1136_v18 = vpop.eup %841  ;;  %v458_v20 = vmul.f32 %v1127_v13, %v1110_v62  ;;  %v445_v32 = vmul.f32 %v1115_v1, %v444_v17  ;;  %vm463_vm12 = vweird.f32 %v1127_v13 }
 0x1cd   :  { %845 = vrcp.f32 %v1123_v10  ;;  %v548_v34 = vmul.f32 %v1136_v18, %v1112_v63  ;;  %vm553_vm13 = vweird.f32 %v1136_v18  ;;  %vm1252_vm1 = vmor %vm462_vm8, %vm463_vm12 }
 0x1ce   :  { %847 = vpow2.f32 %v770_v21  ;;  %v459_v39 = vsub.f32 1.0, %v458_v20  ;;  %v446_v48 = vadd.f32 %v1115_v1, %v445_v32  ;;  %v469_v20 = vor.u32 1.1754944e-38, %v468_v3  ;;  %vm1277_vm3 = vmor %vm552_vm7, %vm553_vm13 }
 0x1cf   :  { %v324_v23 = vpop.xlane.xlu2 %323  ;;  %v1153_v29 = vpop.eup %843  ;;  %849 = vpow2.f32 %v776_v22  ;;  %v549_v49 = vsub.f32 1.0, %v548_v34  ;;  %v1243_v22 = vadd.s32 4294967216, %v1130_v14  ;;  %vm477_vm7 = vweird.f32 %v1123_v10 }
 0x1d0   :  { %v352_v40 = vadd.f32 %v1092_v37, %v324_v23  ;;  %v563_v45 = vmul.f32 %v1153_v29, %v1117_v4  ;;  %v460_v52 = vmul.f32 %v1127_v13, %v459_v39  ;;  %v450_v7 = vsel %vm1214_vm9, %v1115_v1, %v446_v48 }
 0x1d1   :  { %v550_v8 = vmul.f32 %v1136_v18, %v549_v49  ;;  %v571_v1 = vand.u32 2147483647, %v1117_v4  ;;  %v455_v23 = vsel %vm1183_vm6, %v454_v36, %v450_v7  ;;  %v481_v39 = vand.u32 2147483647, %v1123_v10 }
 0x1d2   :  { %v771_v46 = vmul.f32 -1.442695, %v352_v40  ;;  %v564_v5 = vsub.f32 1.0, %v563_v45  ;;  %v461_v11 = vadd.f32 %v1127_v13, %v460_v52  ;;  %vm568_vm4 = vweird.f32 %v1153_v29 }
 0x1d3   :  { %v1172_v41 = vpop.eup %845  ;;  %v551_v27 = vadd.f32 %v1136_v18, %v550_v8  ;;  %vm1264_vm2 = vcmp.eq.f32.partialorder %v571_v1, 8.507059e+37  ;;  %v483_v48 = vand.u32 2147483648, %v1123_v10  ;;  %vm1297_vm6 = vmor %vm567_vm15, %vm568_vm4  ;;  %vm1309_vm8 = vcmp.eq.f32.partialorder %v481_v39, 8.507059e+37 }
 0x1d4   :  { %v848_v51 = vpop.eup %847  ;;  %v473_v54 = vmul.f32 %v1172_v41, %v1123_v10  ;;  %851 = vpow2.f32 %v771_v46  ;;  %v565_v21 = vmul.f32 %v1153_v29, %v564_v5  ;;  %v465_v31 = vsel %vm1252_vm1, %v1127_v13, %v461_v11 }
 0x1d5   :  { %v850_v58 = vpop.eup %849  ;;  %v1206_v61 = vadd.f32 1.0, %v848_v51  ;;  %v687_v13 = vperm.slane %v455_v23, %v1142_v24  ;;  %v555_v46 = vsel %vm1277_vm3, %v1136_v18, %v551_v27  ;;  %v470_v24 = vsel %vm1224_vm10, %v469_v20, %v465_v31 }
 0x1d6   :  { %v1228_v53 = vadd.f32 1.0, %v850_v58  ;;  %v474_v12 = vsub.f32 1.0, %v473_v54  ;;  %v566_v36 = vadd.f32 %v1153_v29, %v565_v21  ;;  %vm478_vm5 = vweird.f32 %v1172_v41 }
 0x1d7   :  { %v336_v56 = vpop.xlane.xlu2 %335  ;;  %v326_v57 = vpop.xlane.xlu0 %325  ;;  %853 = vrcp.f32 %v1206_v61  ;;  %v691_v59 = vperm.slane %v470_v24, %v1148_v26  ;;  %v689_v10 = vsel %vm688_vm11, %v687_v13, %v685_v0  ;;  %v1322_v26 = vsel %vm1236_vm14, %v1203_v60, %v555_v46  ;;  %vm1326_vm10 = vmor %vm477_vm7, %vm478_vm5 }
 0x1d8   :  { %v358_v6 = vadd.f32 %v1092_v37, %v336_v56  ;;  %855 = vrcp.f32 %v1228_v53  ;;  %v475_v32 = vmul.f32 %v1172_v41, %v474_v12  ;;  %v353_v34 = vadd.f32 %v1092_v37, %v326_v57 }
 0x1d9   :  { %v570_v2 = vsel %vm1297_vm6, %v1153_v29, %v566_v36  ;;  %vm696_vm9 = vcmask 261312   ;;  %v484_v0 = vor.u32 1.1754944e-38, %v483_v48  ;;  %v715_v1 = vperm.slane %v1322_v26, %v1145_v25 }
 0x1da   :  { %v777_v16 = vmul.f32 -1.442695, %v358_v6  ;;  %v852_v17 = vpop.eup %851  ;;  %v772_v45 = vmul.f32 -1.442695, %v353_v34  ;;  %v476_v49 = vadd.f32 %v1172_v41, %v475_v32  ;;  %v1337_v60 = vsel %vm1264_vm2, %v574_v38, %v570_v2 }
 0x1db   :  { %v1257_v30 = vadd.f32 1.0, %v852_v17  ;;  %v496_v17 = vand.u32 2147483647, %v1206_v61  ;;  %v498_v19 = vand.u32 2147483648, %v1206_v61  ;;  %v719_v21 = vperm.slane %v1337_v60, %v1177_v42 }
 0x1dc   :  { %857 = vpow2.f32 %v777_v16  ;;  %v480_v47 = vsel %vm1326_vm10, %v1172_v41, %v476_v49  ;;  %v693_v41 = vsel %vm692_vm0, %v691_v59, %v689_v10  ;;  %v588_v23 = vand.u32 2147483648, %v1228_v53 }
 0x1dd   :  { %859 = vrcp.f32 %v1257_v30  ;;  %v1270_v33 = vpop.eup %853  ;;  %v485_v16 = vsel %vm1309_vm8, %v484_v0, %v480_v47  ;;  %v1360_v27 = vadd.s32 4294967248, %v1130_v14  ;;  %vm492_vm11 = vweird.f32 %v1206_v61 }
 0x1de   :  { %861 = vpow2.f32 %v772_v45  ;;  %v1293_v52 = vpop.eup %855  ;;  %v488_v54 = vmul.f32 %v1270_v33, %v1206_v61  ;;  %v695_v62 = vperm.slane %v485_v16, %v1180_v43  ;;  %vm582_vm12 = vweird.f32 %v1228_v53 }
 0x1df   :  { %v328_v35 = vpop.xlane.xlu1 %327  ;;  %v338_v40 = vpop.xlane.xlu0 %337  ;;  %v578_v9 = vmul.f32 %v1293_v52, %v1228_v53  ;;  %vm1369_vm13 = vcmp.eq.f32.partialorder %v496_v17, 8.507059e+37  ;;  %v586_v13 = vand.u32 2147483647, %v1228_v53  ;;  %vm493_vm14 = vweird.f32 %v1270_v33 }
 0x1e0   :  { %v354_v63 = vadd.f32 %v1092_v37, %v328_v35  ;;  %v359_v50 = vadd.f32 %v1092_v37, %v338_v40  ;;  %v489_v8 = vsub.f32 1.0, %v488_v54  ;;  %v499_v40 = vor.u32 1.1754944e-38, %v498_v19  ;;  %vm1404_vm1 = vmor %vm492_vm11, %vm493_vm14 }
 0x1e1   :  { %v579_v32 = vsub.f32 1.0, %v578_v9  ;;  %v1379_v43 = vor.u32 1.1754944e-38, %v588_v23  ;;  %v511_v46 = vand.u32 2147483647, %v1257_v30  ;;  %v513_v24 = vand.u32 2147483648, %v1257_v30 }
 0x1e2   :  { %v773_v56 = vmul.f32 -1.442695, %v354_v63  ;;  %v858_v58 = vpop.eup %857  ;;  %v778_v3 = vmul.f32 -1.442695, %v359_v50  ;;  %v490_v31 = vmul.f32 %v1270_v33, %v489_v8  ;;  %v1388_v18 = vsel %vm696_vm9, %v695_v62, %v693_v41 }
 0x1e3   :  { %v342_v51 = vpop.xlane.xlu2 %341  ;;  %v1313_v5 = vpop.eup %859  ;;  %v1330_v6 = vadd.f32 1.0, %v858_v58  ;;  %v580_v49 = vmul.f32 %v1293_v52, %v579_v32  ;;  %vm507_vm15 = vweird.f32 %v1257_v30  ;;  %v1392_v54 = vadd.s32 4294967240, %v1130_v14 }
 0x1e4   :  { %v361_v57 = vadd.f32 %v1092_v37, %v342_v51  ;;  %863 = vpow2.f32 %v773_v56  ;;  %v503_v11 = vmul.f32 %v1313_v5, %v1257_v30  ;;  %v862_v12 = vpop.eup %861  ;;  %v491_v63 = vadd.f32 %v1270_v33, %v490_v31 }
 0x1e5   :  { %865 = vpow2.f32 %v778_v3  ;;  %v1354_v20 = vadd.f32 1.0, %v862_v12  ;;  %vm583_vm0 = vweird.f32 %v1293_v52  ;;  %vm1408_vm2 = vcmp.eq.f32.partialorder %v586_v13, 8.507059e+37 }
 0x1e6   :  { %v780_v7 = vmul.f32 -1.442695, %v361_v57  ;;  %867 = vrcp.f32 %v1330_v6  ;;  %v504_v34 = vsub.f32 1.0, %v503_v11  ;;  %vm508_vm3 = vweird.f32 %v1313_v5  ;;  %vm1431_vm6 = vmor %vm582_vm12, %vm583_vm0 }
 0x1e7   :  { %v340_v36 = vpop.xlane.xlu1 %339  ;;  %vm1413_vm4 = vcmp.eq.f32.partialorder %v511_v46, 8.507059e+37  ;;  %v514_v10 = vor.u32 1.1754944e-38, %v513_v24  ;;  %v495_v61 = vsel %vm1404_vm1, %v1270_v33, %v491_v63  ;;  %v581_v29 = vadd.f32 %v1293_v52, %v580_v49  ;;  %vm1443_vm7 = vmor %vm507_vm15, %vm508_vm3 }
 0x1e8   :  { %869 = vpow2.f32 %v780_v7  ;;  %v505_v50 = vmul.f32 %v1313_v5, %v504_v34  ;;  %v360_v56 = vadd.f32 %v1092_v37, %v340_v36  ;;  %vm700_vm5 = vcmask 326912  }
 0x1e9   :  { %871 = vrcp.f32 %v1354_v20  ;;  %v601_v7 = vand.u32 2147483647, %v1330_v6  ;;  %v528_v9 = vand.u32 2147483648, %v1354_v20  ;;  %v603_v16 = vand.u32 2147483648, %v1330_v6 }
 0x1ea   :  { %v864_v28 = vpop.eup %863  ;;  %v506_v47 = vadd.f32 %v1313_v5, %v505_v50  ;;  %v779_v11 = vmul.f32 -1.442695, %v360_v56  ;;  %v500_v19 = vsel %vm1369_vm13, %v499_v40, %v495_v61  ;;  %v585_v32 = vsel %vm1431_vm6, %v1293_v52, %v581_v29 }
 0x1eb   :  { %v866_v35 = vpop.eup %865  ;;  %v1367_v38 = vadd.f32 1.0, %v864_v28  ;;  %v344_v48 = vpop.xlane.xlu0 %343  ;;  %vm704_vm9 = vcmask 392512   ;;  %vm597_vm10 = vweird.f32 %v1330_v6  ;;  %vm522_vm11 = vweird.f32 %v1354_v20 }
 0x1ec   :  { %v1374_v44 = vadd.f32 1.0, %v866_v35  ;;  %v1376_v45 = vpop.eup %867  ;;  %v362_v59 = vadd.f32 %v1092_v37, %v344_v48  ;;  %v510_v34 = vsel %vm1443_vm7, %v1313_v5, %v506_v47  ;;  %v526_v30 = vand.u32 2147483647, %v1354_v20 }
 0x1ed   :  { %873 = vrcp.f32 %v1367_v38  ;;  %v593_v58 = vmul.f32 %v1376_v45, %v1330_v6  ;;  %vm708_vm12 = vcmask 458112   ;;  %v529_v62 = vor.u32 1.1754944e-38, %v528_v9 }
 0x1ee   :  { %v870_v51 = vpop.eup %869  ;;  %875 = vrcp.f32 %v1374_v44  ;;  %v781_v17 = vmul.f32 -1.442695, %v362_v59  ;;  %v541_v52 = vand.u32 2147483647, %v1367_v38  ;;  %v543_v13 = vand.u32 2147483648, %v1367_v38 }
 0x1ef   :  { %v872_v57 = vpop.eup %871  ;;  %v1423_v0 = vadd.f32 1.0, %v870_v51  ;;  %v594_v41 = vsub.f32 1.0, %v593_v58  ;;  %v699_v24 = vperm.slane %v500_v19, %v1199_v55  ;;  %v1471_v48 = vsel %vm1408_vm2, %v1379_v43, %v585_v32 }
 0x1f0   :  { %v518_v37 = vmul.f32 %v872_v57, %v1354_v20  ;;  %vm523_vm8 = vweird.f32 %v872_v57  ;;  %v515_v63 = vsel %vm1413_vm4, %v514_v10, %v510_v34  ;;  %vm527_vm15 = vcmp.eq.f32.partialorder %v526_v30, 8.507059e+37 }
 0x1f1   :  { %877 = vrcp.f32 %v1423_v0  ;;  %v595_v40 = vmul.f32 %v1376_v45, %v594_v41  ;;  %vm524_vm13 = vmor %vm522_vm11, %vm523_vm8  ;;  %v604_v49 = vor.u32 1.1754944e-38, %v603_v16  ;;  %vm537_vm0 = vweird.f32 %v1367_v38 }
 0x1f2   :  { %v519_v8 = vsub.f32 1.0, %v518_v37  ;;  %879 = vpow2.f32 %v779_v11  ;;  %vm598_vm1 = vweird.f32 %v1376_v45  ;;  %v544_v55 = vor.u32 1.1754944e-38, %v543_v13 }
 0x1f3   :  { %v874_v12 = vpop.eup %873  ;;  %881 = vpow2.f32 %v781_v17  ;;  %v596_v56 = vadd.f32 %v1376_v45, %v595_v40  ;;  %v703_v58 = vperm.slane %v515_v63, %v1347_v15  ;;  %vm542_vm2 = vcmp.eq.f32.partialorder %v541_v52, 8.507059e+37  ;;  %vm1488_vm4 = vmor %vm597_vm10, %vm598_vm1 }
 0x1f4   :  { %v520_v53 = vmul.f32 %v872_v57, %v519_v8  ;;  %v533_v28 = vmul.f32 %v874_v12, %v1367_v38  ;;  %v1448_v31 = vpop.eup %875  ;;  %vm538_vm14 = vweird.f32 %v874_v12  ;;  %v701_v3 = vsel %vm700_vm5, %v699_v24, %v1388_v18 }
 0x1f5   :  { %v608_v20 = vmul.f32 %v1448_v31, %v1374_v44  ;;  %vm539_vm3 = vmor %vm537_vm0, %vm538_vm14  ;;  %v616_v29 = vand.u32 2147483647, %v1374_v44  ;;  %v618_v47 = vand.u32 2147483648, %v1374_v44  ;;  %vm712_vm5 = vcmask 523712  }
 0x1f6   :  { %v521_v35 = vadd.f32 %v872_v57, %v520_v53  ;;  %v534_v39 = vsub.f32 1.0, %v533_v28  ;;  %v705_v9 = vsel %vm704_vm9, %v703_v58, %v701_v3  ;;  %vm602_vm6 = vcmp.eq.f32.partialorder %v601_v7, 8.507059e+37 }
 0x1f7   :  { %v1465_v46 = vpop.eup %877  ;;  %v609_v2 = vsub.f32 1.0, %v608_v20  ;;  %v646_v33 = vand.u32 2147483647, %v1423_v0  ;;  %v723_v41 = vperm.slane %v1471_v48, %v1243_v22  ;;  %vm716_vm7 = vcmask 589312  }
 0x1f8   :  { %v525_v5 = vsel %vm524_vm13, %v872_v57, %v521_v35  ;;  %v535_v36 = vmul.f32 %v874_v12, %v534_v39  ;;  %v638_v57 = vmul.f32 %v1465_v46, %v1423_v0  ;;  %v880_v43 = vpop.eup %879  ;;  %vm612_vm8 = vweird.f32 %v1374_v44 }
 0x1f9   :  { %v530_v50 = vsel %vm527_vm15, %v529_v62, %v525_v5  ;;  %v882_v4 = vpop.eup %881  ;;  %v1484_v37 = vadd.f32 1.0, %v880_v43  ;;  %v610_v11 = vmul.f32 %v1448_v31, %v609_v2  ;;  %vm1513_vm9 = vcmp.eq.f32.partialorder %v616_v29, 8.507059e+37 }
 0x1fa   :  { %v536_v51 = vadd.f32 %v874_v12, %v535_v36  ;;  %v707_v38 = vperm.slane %v530_v50, %v1360_v27  ;;  %v1495_v8 = vadd.f32 1.0, %v882_v4  ;;  %v600_v27 = vsel %vm1488_vm4, %v1376_v45, %v596_v56 }
 0x1fb   :  { %v639_v18 = vsub.f32 1.0, %v638_v57  ;;  %883 = vrcp.f32 %v1484_v37  ;;  %v726_v45 = vadd.s32 4294967208, %v1130_v14  ;;  %v605_v16 = vsel %vm602_vm6, %v604_v49, %v600_v27 }
 0x1fc   :  { %v540_v59 = vsel %vm539_vm3, %v874_v12, %v536_v51  ;;  %885 = vrcp.f32 %v1495_v8  ;;  %v709_v12 = vsel %vm708_vm12, %v707_v38, %v705_v9  ;;  %v619_v6 = vor.u32 1.1754944e-38, %v618_v47 }
 0x1fd   :  { %v545_v10 = vsel %vm542_vm2, %v544_v55, %v540_v59  ;;  %v640_v7 = vmul.f32 %v1465_v46, %v639_v18  ;;  %v611_v23 = vadd.f32 %v1448_v31, %v610_v11  ;;  %vm613_vm10 = vweird.f32 %v1448_v31 }
 0x1fe   :  { %v711_v15 = vperm.slane %v545_v10, %v1392_v54  ;;  %v648_v54 = vand.u32 2147483648, %v1423_v0  ;;  %vm642_vm11 = vweird.f32 %v1423_v0  ;;  %vm1521_vm12 = vcmp.eq.f32.partialorder %v646_v33, 8.507059e+37  ;;  %vm1533_vm1 = vmor %vm612_vm8, %vm613_vm10 }
 0x1ff   :  { %vm720_vm13 = vcmask 654912   ;;  %vm724_vm14 = vcmask 720512   ;;  %v727_v34 = vperm.slane %v605_v16, %v726_v45  ;;  %vm643_vm15 = vweird.f32 %v1465_v46 }
 0x200   :  { %v713_v17 = vsel %vm712_vm5, %v711_v15, %v709_v12  ;;  %v649_v53 = vor.u32 1.1754944e-38, %v648_v54  ;;  %vm728_vm0 = vcmask 786112   ;;  %v730_v62 = vadd.s32 4294967200, %v1130_v14  ;;  %vm1553_vm5 = vmor %vm642_vm11, %vm643_vm15 }
 0x201   :  { %v884_v22 = vpop.eup %883  ;;  %v717_v32 = vsel %vm716_vm7, %v715_v1, %v713_v17  ;;  %v641_v26 = vadd.f32 %v1465_v46, %v640_v7  ;;  %vm732_vm3 = vcmask 851712   ;;  %v734_v1 = vadd.s32 4294967192, %v1130_v14 }
 0x202   :  { %v886_v30 = vpop.eup %885  ;;  %v623_v35 = vmul.f32 %v884_v22, %v1484_v37  ;;  %v615_v52 = vsel %vm1533_vm1, %v1448_v31, %v611_v23  ;;  %v721_v44 = vsel %vm720_vm13, %v719_v21, %v717_v32  ;;  %vm736_vm2 = vcmask 917312  }
 0x203   :  { %v653_v25 = vmul.f32 %v886_v30, %v1495_v8  ;;  %v631_v13 = vand.u32 2147483647, %v1484_v37  ;;  %v633_v5 = vand.u32 2147483648, %v1484_v37  ;;  %v738_v20 = vadd.s32 4294967184, %v1130_v14 }
 0x204   :  { %v624_v40 = vsub.f32 1.0, %v623_v35  ;;  %vm628_vm4 = vweird.f32 %v884_v22  ;;  %v661_v42 = vand.u32 2147483647, %v1495_v8  ;;  %v663_v60 = vand.u32 2147483648, %v1495_v8 }
 0x205   :  { %v654_v36 = vsub.f32 1.0, %v653_v25  ;;  %v645_v48 = vsel %vm1553_vm5, %v1465_v46, %v641_v26  ;;  %vm658_vm6 = vweird.f32 %v886_v30  ;;  %v725_v63 = vsel %vm724_vm14, %v723_v41, %v721_v44 }
 0x206   :  { %v625_v24 = vmul.f32 %v884_v22, %v624_v40  ;;  %vm627_vm7 = vweird.f32 %v1484_v37  ;;  %v620_v0 = vsel %vm1513_vm9, %v619_v6, %v615_v52  ;;  %vm657_vm8 = vweird.f32 %v1495_v8 }
 0x207   :  { %v655_v21 = vmul.f32 %v886_v30, %v654_v36  ;;  %vm629_vm10 = vmor %vm627_vm7, %vm628_vm4  ;;  %vm632_vm11 = vcmp.eq.f32.partialorder %v631_v13, 8.507059e+37  ;;  %v634_v50 = vor.u32 1.1754944e-38, %v633_v5  ;;  %v742_v56 = vadd.s32 4294967176, %v1130_v14 }
 0x208   :  { %v626_v49 = vadd.f32 %v884_v22, %v625_v24  ;;  %v650_v46 = vsel %vm1521_vm12, %v649_v53, %v645_v48  ;;  %vm659_vm13 = vmor %vm657_vm8, %vm658_vm6  ;;  %v664_v57 = vor.u32 1.1754944e-38, %v663_v60  ;;  %v729_v43 = vsel %vm728_vm0, %v727_v34, %v725_v63 }
 0x209   :  { %v656_v51 = vadd.f32 %v886_v30, %v655_v21  ;;  %vm662_vm14 = vcmp.eq.f32.partialorder %v661_v42, 8.507059e+37  ;;  %v731_v2 = vperm.slane %v620_v0, %v730_v62  ;;  %vm740_vm9 = vcmask 982912  }
 0x20a   :  { %v630_v55 = vsel %vm629_vm10, %v884_v22, %v626_v49  ;;  %v739_v38 = vperm.slane %v650_v46, %v738_v20  ;;  %vm744_vm12 = vcmask 1048512  }
 0x20b   :  { %v635_v58 = vsel %vm632_vm11, %v634_v50, %v630_v55  ;;  %v660_v59 = vsel %vm659_vm13, %v886_v30, %v656_v51  ;;  %v733_v14 = vsel %vm732_vm3, %v731_v2, %v729_v43 }
 0x20c   :  { %v665_v4 = vsel %vm662_vm14, %v664_v57, %v660_v59  ;;  %v735_v3 = vperm.slane %v635_v58, %v734_v1 }
 0x20d   :  { %v743_v10 = vperm.slane %v665_v4, %v742_v56 }
 0x20e   :  { %v737_v37 = vsel %vm736_vm2, %v735_v3, %v733_v14 }
 0x20f   :  { %v741_v61 = vsel %vm740_vm9, %v739_v38, %v737_v37 }
 0x210   :  { %v745_v15 = vsel %vm744_vm12, %v743_v10, %v741_v61 }
 0x211   :  { %747 = vst [vmem:[#allocation9] sm:$0x1] %v745_v15 }
 0x212   :  { %758 = dma.vmem_to_hbm [thread:$0]  %s754_s20, 16, %s756_s23, [#allocation5]  }
 0x213   :  { %987 = dma.done.wait [#allocation5], 16  }
 0x214   :  { %988 = vsyncadd [#allocation5], 4294967280 }
 0x215   :  { %763 = vsyncpa [#allocation4], 1 }
 0x216   :  { %764 = vsyncpa [#allocation7], 1 }
 0x217   :  { %765 = vsyncpa [#allocation5], 1 }

</bundles_post_ra>
